<compile_context>
chip_gen: v7x
topology: tpu7x:2x2x1
jax: 0.10.0
libtpu: 0.0.40
codegen_flags: <defaults>
</compile_context>

<pallas_src>
import jax
import jax.numpy as jnp
import numpy as np
from jax.experimental import pallas as pl
from jax.experimental.pallas import tpu as pltpu


_MIN_SPLIT = 256   # batches >= 2*_MIN_SPLIT always get >= 2 grid steps


def _round_up(x, m):
    return -(-x // m) * m


def _mish(x):
    # Mish(x) = x * tanh(softplus(x)) = x * e*(e+2) / (e*(e+2) + 2),  e = exp(x).
    # Clamp so e*(e+2) stays finite in f32 (|x| >= ~30 already saturates).
    # Exact divide: the kernel is memory-bound, the extra VPU/EUP work is free.
    e = jnp.exp(jnp.clip(x, -30.0, 30.0))
    n = e * (e + 2.0)
    return x * n / (n + 2.0)


def _dnn_kernel(x_ref, we_ref, be_ref, wp1_ref, bp1_ref, wp2_ref, bp2_ref,
                pred_ref, emb_ref):
    f32 = jnp.float32
    bf16 = jnp.bfloat16

    x = x_ref[...]

    # embedding_layer: Linear(in_feats, 128)   (bf16 MXU operands, f32 accum)
    emb = jnp.dot(x.astype(bf16), we_ref[...],
                  preferred_element_type=f32) + be_ref[...]

    # predictor: Linear(128, 32) -> (Dropout p=0) -> Mish -> Linear(32, 1)
    h = jnp.dot(emb.astype(bf16), wp1_ref[...],
                preferred_element_type=f32) + bp1_ref[...]
    h = _mish(h)
    # 1-wide head on the VPU: broadcast-multiply by the (1, 32) weight row and
    # lane-reduce.  Writes a true [TB, 1] block (masked vst, negligible) instead
    # of a 128-lane-padded f32 slab.
    pred = jnp.sum(h * wp2_ref[...], axis=-1, keepdims=True) + bp2_ref[...]

    emb_ref[...] = emb.astype(emb_ref.dtype)
    pred_ref[...] = pred.astype(pred_ref.dtype)


def dnn_forward(cat_feat, params, *, batch_tile=1024, out_dtype=jnp.float32):
    """cat_feat: f32 [B, in_feats].  Returns (pred [B, 1], embedding [B, 128])."""
    B, in_feats = cat_feat.shape
    emb_dim = params["we"].shape[1]   # 128

    # --- batch tiling policy -------------------------------------------------
    # Pad the batch to a sublane multiple of 8, then choose a step count:
    #   * ceil(B / batch_tile) steps for large batches,
    #   * at least 2 steps once B >= 2*_MIN_SPLIT (pipelining + v7x megacore),
    #   * even step count when tiled (balanced across v7x's 2 TensorCores).
    # The batch is padded up to n_steps * TB so the grid always divides evenly
    # (no whole-array fallback; VMEM stays bounded for any B).
    B_pad = max(8, _round_up(B, 8))
    n_steps = -(-B_pad // batch_tile)
    if n_steps == 1 and B_pad >= 2 * _MIN_SPLIT:
        n_steps = 2
    if n_steps > 1 and (n_steps % 2):
        n_steps += 1
    TB = _round_up(-(-B_pad // n_steps), 8)
    B_full = n_steps * TB

    if B_full != B:
        cat_feat = jnp.pad(cat_feat, ((0, B_full - B), (0, 0)))

    def w_spec(shape):
        # Constant block index: weights stay VMEM-resident across grid steps.
        return pl.BlockSpec(shape, lambda i: (0, 0))

    pred, emb = pl.pallas_call(
        _dnn_kernel,
        out_shape=(
            jax.ShapeDtypeStruct((B_full, 1), out_dtype),
            jax.ShapeDtypeStruct((B_full, emb_dim), out_dtype),
        ),
        grid=(n_steps,),
        in_specs=[
            pl.BlockSpec((TB, in_feats), lambda i: (i, 0)),
            w_spec(params["we"].shape), w_spec(params["be"].shape),
            w_spec(params["wp1"].shape), w_spec(params["bp1"].shape),
            w_spec(params["wp2"].shape), w_spec(params["bp2"].shape),
        ],
        out_specs=(
            pl.BlockSpec((TB, 1), lambda i: (i, 0)),
            pl.BlockSpec((TB, emb_dim), lambda i: (i, 0)),
        ),
        compiler_params=pltpu.CompilerParams(
            dimension_semantics=("parallel",),
            vmem_limit_bytes=16 << 20,
        ),
    )(cat_feat, params["we"], params["be"], params["wp1"], params["bp1"],
      params["wp2"], params["bp2"])

    if B_full != B:
        pred, emb = pred[:B], emb[:B]
    return pred, emb


def init_params(key, in_feats):
    """Deterministic synthetic init matching nn.Linear default (uniform +-1/sqrt(fan_in))."""
    keys = jax.random.split(key, 6)

    def lin(kw, kb, fan_in, fan_out):
        s = 1.0 / jnp.sqrt(jnp.float32(fan_in))
        w = jax.random.uniform(kw, (fan_in, fan_out), jnp.float32, -s, s)
        b = jax.random.uniform(kb, (1, fan_out), jnp.float32, -s, s)
        return w, b

    we, be = lin(keys[0], keys[1], in_feats, 128)   # embedding_layer
    wp1, bp1 = lin(keys[2], keys[3], 128, 32)       # predictor[0]
    wp2, bp2 = lin(keys[4], keys[5], 32, 1)         # predictor[3]

    return {
        # Matmul weights in bf16 (halves weight DMA, native MXU datapath);
        # biases and the 1-wide head stay f32 (VPU path inside the kernel).
        "we": we.astype(jnp.bfloat16), "be": be,
        "wp1": wp1.astype(jnp.bfloat16), "bp1": bp1,
        "wp2": wp2.T,                    # (1, 32) f32 row for broadcast-multiply
        "bp2": bp2,                      # (1, 1)  f32
    }


if __name__ == "__main__":
    key = jax.random.PRNGKey(0)
    k_param, k_x = jax.random.split(key)

    in_feats = 64
    B = 8

    params = init_params(k_param, in_feats)
    cat_feat = jax.random.normal(k_x, (B, in_feats), jnp.float32)

    fwd = jax.jit(dnn_forward)
    pred, embedding = fwd(cat_feat, params)
    jax.block_until_ready((pred, embedding))

    assert pred.shape == (B, 1)
    assert embedding.shape == (B, 128)

    # Pure-JAX f32 reference; loose tolerance covers the bf16 MXU operand casts.
    we_f = params["we"].astype(jnp.float32)
    wp1_f = params["wp1"].astype(jnp.float32)
    emb_r = cat_feat @ we_f + params["be"]
    h_r = emb_r @ wp1_f + params["bp1"]
    h_r = h_r * jnp.tanh(jax.nn.softplus(h_r))
    pred_r = jnp.sum(h_r * params["wp2"], axis=-1, keepdims=True) + params["bp2"]

    np.testing.assert_allclose(np.asarray(embedding), np.asarray(emb_r),
                               rtol=5e-2, atol=5e-2)
    np.testing.assert_allclose(np.asarray(pred), np.asarray(pred_r),
                               rtol=5e-2, atol=5e-2)
    assert bool(jnp.all(jnp.isfinite(pred))) and bool(jnp.all(jnp.isfinite(embedding)))
    print("KERNEL_OK")
</pallas_src>

<mosaic_0001>
module attributes {stable_mosaic.version = 11 : i64} {
  func.func @_dnn_kernel(%arg0: i32, %arg1: memref<8x64xf32, #tpu.memory_space<vmem>>, %arg2: memref<64x128xbf16, #tpu.memory_space<vmem>>, %arg3: memref<1x128xf32, #tpu.memory_space<vmem>>, %arg4: memref<128x32xbf16, #tpu.memory_space<vmem>>, %arg5: memref<1x32xf32, #tpu.memory_space<vmem>>, %arg6: memref<1x32xf32, #tpu.memory_space<vmem>>, %arg7: memref<1x1xf32, #tpu.memory_space<vmem>>, %arg8: memref<8x1xf32, #tpu.memory_space<vmem>>, %arg9: memref<8x128xf32, #tpu.memory_space<vmem>>) attributes {dimension_semantics = [#tpu.dimension_semantics<parallel>], iteration_bounds = array<i64: 1>, scalar_prefetch = 0 : i64, scratch_operands = 0 : i64, tpu.core_type = #tpu.core_type<tc>, window_params = [{transform_indices = @transform_0, window_bounds = array<i64: 8, 64>}, {pipeline_mode = #tpu.pipeline_mode<synchronous>, transform_indices = @transform_1, window_bounds = array<i64: 64, 128>}, {pipeline_mode = #tpu.pipeline_mode<synchronous>, transform_indices = @transform_2, window_bounds = array<i64: 1, 128>}, {pipeline_mode = #tpu.pipeline_mode<synchronous>, transform_indices = @transform_3, window_bounds = array<i64: 128, 32>}, {pipeline_mode = #tpu.pipeline_mode<synchronous>, transform_indices = @transform_4, window_bounds = array<i64: 1, 32>}, {pipeline_mode = #tpu.pipeline_mode<synchronous>, transform_indices = @transform_5, window_bounds = array<i64: 1, 32>}, {pipeline_mode = #tpu.pipeline_mode<synchronous>, transform_indices = @transform_6, window_bounds = array<i64: 1, 1>}, {transform_indices = @transform_7, window_bounds = array<i64: 8, 1>}, {transform_indices = @transform_8, window_bounds = array<i64: 8, 128>}]} {
    %c0 = arith.constant 0 : index
    %c0_0 = arith.constant 0 : index
    %0 = vector.load %arg1[%c0, %c0_0] : memref<8x64xf32, #tpu.memory_space<vmem>>, vector<8x64xf32>
    %1 = arith.truncf %0 : vector<8x64xf32> to vector<8x64xbf16>
    %c0_1 = arith.constant 0 : index
    %c0_2 = arith.constant 0 : index
    %2 = vector.load %arg2[%c0_1, %c0_2] : memref<64x128xbf16, #tpu.memory_space<vmem>>, vector<64x128xbf16>
    %cst = arith.constant dense<0.000000e+00> : vector<8x128xf32>
    %3 = tpu.matmul %1, %2, %cst {dimension_numbers = #tpu.dot_dimension_numbers<[1], [0], [0], [1], [0, 0, 1, 1], [], []>} : vector<8x64xbf16>, vector<64x128xbf16>, vector<8x128xf32> -> vector<8x128xf32>
    %c0_3 = arith.constant 0 : index
    %c0_4 = arith.constant 0 : index
    %4 = vector.load %arg3[%c0_3, %c0_4] : memref<1x128xf32, #tpu.memory_space<vmem>>, vector<1x128xf32>
    %5 = vector.broadcast %4 : vector<1x128xf32> to vector<8x128xf32>
    %6 = arith.addf %3, %5 : vector<8x128xf32>
    %7 = arith.truncf %6 : vector<8x128xf32> to vector<8x128xbf16>
    %c0_5 = arith.constant 0 : index
    %c0_6 = arith.constant 0 : index
    %8 = vector.load %arg4[%c0_5, %c0_6] : memref<128x32xbf16, #tpu.memory_space<vmem>>, vector<128x32xbf16>
    %cst_7 = arith.constant dense<0.000000e+00> : vector<8x32xf32>
    %9 = tpu.matmul %7, %8, %cst_7 {dimension_numbers = #tpu.dot_dimension_numbers<[1], [0], [0], [1], [0, 0, 1, 1], [], []>} : vector<8x128xbf16>, vector<128x32xbf16>, vector<8x32xf32> -> vector<8x32xf32>
    %c0_8 = arith.constant 0 : index
    %c0_9 = arith.constant 0 : index
    %10 = vector.load %arg5[%c0_8, %c0_9] : memref<1x32xf32, #tpu.memory_space<vmem>>, vector<1x32xf32>
    %11 = vector.broadcast %10 : vector<1x32xf32> to vector<8x32xf32>
    %12 = arith.addf %9, %11 : vector<8x32xf32>
    %cst_10 = arith.constant -3.000000e+01 : f32
    %cst_11 = arith.constant 3.000000e+01 : f32
    %13 = vector.broadcast %cst_10 : f32 to vector<8x32xf32>
    %14 = arith.maximumf %13, %12 : vector<8x32xf32>
    %15 = vector.broadcast %cst_11 : f32 to vector<8x32xf32>
    %16 = arith.minimumf %15, %14 : vector<8x32xf32>
    %17 = math.exp %16 : vector<8x32xf32>
    %cst_12 = arith.constant 2.000000e+00 : f32
    %18 = vector.broadcast %cst_12 : f32 to vector<8x32xf32>
    %19 = arith.addf %17, %18 : vector<8x32xf32>
    %20 = arith.mulf %17, %19 : vector<8x32xf32>
    %21 = arith.mulf %12, %20 : vector<8x32xf32>
    %cst_13 = arith.constant 2.000000e+00 : f32
    %22 = vector.broadcast %cst_13 : f32 to vector<8x32xf32>
    %23 = arith.addf %20, %22 : vector<8x32xf32>
    %24 = arith.divf %21, %23 : vector<8x32xf32>
    %c0_14 = arith.constant 0 : index
    %c0_15 = arith.constant 0 : index
    %25 = vector.load %arg6[%c0_14, %c0_15] : memref<1x32xf32, #tpu.memory_space<vmem>>, vector<1x32xf32>
    %26 = vector.broadcast %25 : vector<1x32xf32> to vector<8x32xf32>
    %27 = arith.mulf %24, %26 : vector<8x32xf32>
    %cst_16 = arith.constant dense<0.000000e+00> : vector<8xf32>
    %28 = vector.multi_reduction <add>, %27, %cst_16 [1] : vector<8x32xf32> to vector<8xf32>
    %29 = vector.shape_cast %28 : vector<8xf32> to vector<8x1xf32>
    %c0_17 = arith.constant 0 : index
    %c0_18 = arith.constant 0 : index
    %30 = vector.load %arg7[%c0_17, %c0_18] : memref<1x1xf32, #tpu.memory_space<vmem>>, vector<1x1xf32>
    %31 = vector.broadcast %30 : vector<1x1xf32> to vector<8x1xf32>
    %32 = arith.addf %29, %31 : vector<8x1xf32>
    %c0_19 = arith.constant 0 : index
    %c0_20 = arith.constant 0 : index
    %33 = vector.load %arg9[%c0_19, %c0_20] : memref<8x128xf32, #tpu.memory_space<vmem>>, vector<8x128xf32>
    tpu.vector_store %arg9[%c0_19, %c0_20], %6 {strides = array<i32>} : memref<8x128xf32, #tpu.memory_space<vmem>>, vector<8x128xf32>,
    %c0_21 = arith.constant 0 : index
    %c0_22 = arith.constant 0 : index
    %34 = vector.load %arg8[%c0_21, %c0_22] : memref<8x1xf32, #tpu.memory_space<vmem>>, vector<8x1xf32>
    tpu.vector_store %arg8[%c0_21, %c0_22], %32 {strides = array<i32>} : memref<8x1xf32, #tpu.memory_space<vmem>>, vector<8x1xf32>,
    return
  }
  func.func @transform_0(%arg0: i32) -> (i32, i32) {
    %c0_i32 = arith.constant 0 : i32
    %c0_i32_0 = arith.constant 0 : i32
    return %arg0, %c0_i32 : i32, i32
  }
  func.func @transform_1(%arg0: i32) -> (i32, i32) {
    %c0_i32 = arith.constant 0 : i32
    %c0_i32_0 = arith.constant 0 : i32
    %c0_i32_1 = arith.constant 0 : i32
    return %c0_i32, %c0_i32_0 : i32, i32
  }
  func.func @transform_2(%arg0: i32) -> (i32, i32) {
    %c0_i32 = arith.constant 0 : i32
    %c0_i32_0 = arith.constant 0 : i32
    %c0_i32_1 = arith.constant 0 : i32
    return %c0_i32, %c0_i32_0 : i32, i32
  }
  func.func @transform_3(%arg0: i32) -> (i32, i32) {
    %c0_i32 = arith.constant 0 : i32
    %c0_i32_0 = arith.constant 0 : i32
    %c0_i32_1 = arith.constant 0 : i32
    return %c0_i32, %c0_i32_0 : i32, i32
  }
  func.func @transform_4(%arg0: i32) -> (i32, i32) {
    %c0_i32 = arith.constant 0 : i32
    %c0_i32_0 = arith.constant 0 : i32
    %c0_i32_1 = arith.constant 0 : i32
    return %c0_i32, %c0_i32_0 : i32, i32
  }
  func.func @transform_5(%arg0: i32) -> (i32, i32) {
    %c0_i32 = arith.constant 0 : i32
    %c0_i32_0 = arith.constant 0 : i32
    %c0_i32_1 = arith.constant 0 : i32
    return %c0_i32, %c0_i32_0 : i32, i32
  }
  func.func @transform_6(%arg0: i32) -> (i32, i32) {
    %c0_i32 = arith.constant 0 : i32
    %c0_i32_0 = arith.constant 0 : i32
    %c0_i32_1 = arith.constant 0 : i32
    return %c0_i32, %c0_i32_0 : i32, i32
  }
  func.func @transform_7(%arg0: i32) -> (i32, i32) {
    %c0_i32 = arith.constant 0 : i32
    %c0_i32_0 = arith.constant 0 : i32
    return %arg0, %c0_i32 : i32, i32
  }
  func.func @transform_8(%arg0: i32) -> (i32, i32) {
    %c0_i32 = arith.constant 0 : i32
    %c0_i32_0 = arith.constant 0 : i32
    return %arg0, %c0_i32 : i32, i32
  }
}

</mosaic_0001>

<bundles_post_ra>
// kernel: dnn_forward.1
= control target key start
LH: loop header
LB: loop body
LE: loop exit
PB: predicated region body
PF: predicated region fallthrough
CT: control target
= control target key end

     0   :  { %s501_s0 = inlined_call_operand.vmem [shape: f32[8,64], index: 0, kind: input, shape index: {}]   ;;  %s502_s1 = inlined_call_operand.vmem [shape: bf16[64,128], index: 1, kind: input, shape index: {}]   ;;  %s503_s2 = inlined_call_operand.vmem [shape: f32[1,128], index: 2, kind: input, shape index: {}]   ;;  %s504_s3 = inlined_call_operand.vmem [shape: bf16[128,32], index: 3, kind: input, shape index: {}]   ;;  %s505_s4 = inlined_call_operand.vmem [shape: f32[1,32], index: 4, kind: input, shape index: {}]   ;;  %s506_s5 = inlined_call_operand.vmem [shape: f32[1,32], index: 5, kind: input, shape index: {}]   ;;  %s507_s6 = inlined_call_operand.<no memory space> [shape: f32[1,1], index: 6, kind: input, shape index: {}]   ;;  %s508_s7 = inlined_call_operand.vmem [shape: f32[8,1], index: 7, kind: output, shape index: {0}]   ;;  %s509_s8 = inlined_call_operand.hbm [shape: f32[8,128], index: 8, kind: output, shape index: {1}]  }
   0x1   :  { %v14_v0 = vstv %s507_s6 }
   0x2   :  { %15 = vst [vmem:[#allocation2] sm:$0x1] %v14_v0 }
   0x3   :  { %v347_v1 = vld [vmem:[%s502_s1] sm:$0xff]   ;;  %v387_v2 = vmov 0.0   ;;  %v348_v3 = vld [vmem:[%s502_s1 + $0x8] sm:$0xff]   ;;  %vm388_vm0 = vmmov 0   ;;  %v349_v5 = vld [vmem:[%s502_s1 + $0x10] sm:$0xff]  }
   0x4   :  { %312 = vmatprep.subr.bf16.mxu0 %v387_v2  ;;  %324 = vmatprep.subr.bf16.mxu1 %v387_v2  ;;  %v351_v4 = vld [vmem:[%s504_s3] sm:$0xff]   ;;  %v352_v6 = vld [vmem:[%s504_s3 + $0x8] sm:$0xff]   ;;  %v350_v7 = vld [vmem:[%s502_s1 + $0x18] sm:$0xff]  }
   0x5   :  { %313 = vmatpush3.bf16.msra.mxu0 %v347_v1  ;;  %320 = vmatprep.mubr.msk.bf16.mxu0 %vm388_vm0, %v387_v2  ;;  %v32_v8 = vld [vmem:[%s501_s0] sm:$0xff]  ;;  %v353_v9 = vld [vmem:[%s504_s3 + $0x10] sm:$0xff]  }
   0x6   :  { %314 = vmatprep.subr.bf16.mxu0 %v387_v2  ;;  %340 = vmatprep.mubr.msk.bf16.mxu1 %vm388_vm0, %v387_v2 }
   0x7   :  { %325 = vmatpush3.bf16.msra.mxu1 %v351_v4 }
   0x8   :  { %326 = vmatprep.subr.bf16.mxu1 %v387_v2 }
   0x9   :  { %315 = vmatpush3.bf16.msra.mxu0 %v348_v3 }
   0xa   :  { %316 = vmatprep.subr.bf16.mxu0 %v387_v2 }
   0xb   :  { %327 = vmatpush3.bf16.msra.mxu1 %v352_v6 }
   0xc   :  { %328 = vmatprep.subr.bf16.mxu1 %v387_v2 }
   0xd   :  { %317 = vmatpush3.bf16.msra.mxu0 %v349_v5 }
   0xe   :  { %318 = vmatprep.subr.bf16.mxu0 %v387_v2 }
   0xf   :  { %16 = vsyncpa [#allocation4], 0  ;;  %v33_v10 = vpack.c.bf16 %v32_v8, %v32_v8  ;;  %vm73_vm1 = vcmask 523264   ;;  %329 = vmatpush3.bf16.msra.mxu1 %v353_v9  ;;  %v354_v11 = vld [vmem:[%s504_s3 + $0x18] sm:$0xff]   ;;  %v355_v12 = vld [vmem:[%s504_s3 + $0x20] sm:$0xff]   ;;  %vm247_vm2 = vcmask 261120  }
  0x10   :  { %330 = vmatprep.subr.bf16.mxu1 %v387_v2  ;;  %v356_v13 = vld [vmem:[%s504_s3 + $0x28] sm:$0xff]   ;;  %v357_v14 = vld [vmem:[%s504_s3 + $0x30] sm:$0xff]   ;;  %v358_v15 = vld [vmem:[%s504_s3 + $0x38] sm:$0xff]  }
  0x11   :  { %319 = vmatpush3.bf16.msra.mxu0 %v350_v7  ;;  %v280_v16 = vld [vmem:[%s503_s2] ss:$0 sm:$0xff] }
  0x12   :  { %v286_v23 = vld [vmem:[%s505_s4] ss:$0 sm:$0xff]  ;;  %s389_s4 = smov [#allocation3]  }
  0x13   :  { %331 = vmatpush3.bf16.msra.mxu1 %v354_v11  ;;  %v296_v37 = vld [vmem:[%s506_s5] ss:$0 sm:$0xff]  ;;  %s270_s12 = sshll.u32 %s389_s4, 4  ;;  %s271_s12 = int_to_ptr.vmem [resolvable:$true] %s270_s12 }
  0x14   :  { %321 = vmatmul.mubr.msk.bf16.vlgmr.msra.gmra.mrb[0].mxu0 %vm73_vm1, %v33_v10  ;;  %332 = vmatprep.subr.bf16.mxu1 %v387_v2  ;;  %s363_s6 = scalar_lea.vmem %s271_s12, 128  ;;  %p368_p1 = scmp.lt.s32.totalorder %s271_s12, %s271_s12 }
  0x15   :  { %p364_p0 = scmp.ne.s32.totalorder %s271_s12, %s363_s6  ;;  %p369_p2 = scmp.lt.s32.totalorder %s363_s6, %s363_s6 }
  0x17   :  { %333 = vmatpush3.bf16.msra.mxu1 %v355_v12  ;;  %p370_p3 = por %p369_p2, %p368_p1 }
  0x18   :  { %334 = vmatprep.subr.bf16.mxu1 %v387_v2 }
  0x19   :  { %p371_p4 = pnand %p370_p3, %p364_p0 }
  0x1b   :  { %335 = vmatpush3.bf16.msra.mxu1 %v356_v13 }
  0x1c   :  { %336 = vmatprep.subr.bf16.mxu1 %v387_v2 }
  0x1f   :  { %337 = vmatpush3.bf16.msra.mxu1 %v357_v14 }
  0x20   :  { %338 = vmatprep.subr.bf16.mxu1 %v387_v2 }
  0x23   :  { %339 = vmatpush3.bf16.msra.mxu1 %v358_v15 }
  0xe7   :  { %v111_v17 = vpop.f32.mrb[0].mxu0 }
  0xe8   :  { %v112_v18 = vadd.f32 %v280_v16, %v111_v17  ;;  %v322_v19 = vpop.f32.mrb[1].mxu0 }
  0xe9   :  { %v114_v20 = vpop.f32.mrb[2].mxu0 }
  0xea   :  { %v117_v21 = vpack.c.bf16 %v112_v18, %v112_v18  ;;  %259 = vst [vmem:[#allocation3] sm:$0xff] %v112_v18  ;;  %v323_v22 = vpop.f32.mrb[3].mxu0 }
  0xec   :  { %341 = vmatmul.mubr.bf16.vlgmr.msra.gmra.mrb[0].mxu1 %v117_v21 }
 0x1bf   :  { %v223_v24 = vpop.f32.mrb[0].mxu1 }
 0x1c0   :  { %v224_v25 = vadd.f32 %v286_v23, %v223_v24  ;;  %v342_v26 = vpop.f32.mrb[1].mxu1 }
 0x1c1   :  { %v226_v27 = vpop.f32.mrb[2].mxu1 }
 0x1c2   :  { %v295_v28 = vclamps-f32 %v224_v25, 30.0  ;;  %v343_v29 = vpop.f32.mrb[3].mxu1 }
 0x1c4   :  { %v231_v30 = vmul.f32 1.442695, %v295_v28 }
 0x1c6   :  { %359 = vpow2.f32 %v231_v30 }
 0x1d0   :  { %v360_v31 = vpop.eup %359 }
 0x1d1   :  { %v233_v32 = vadd.f32 2.0, %v360_v31 }
 0x1d3   :  { %v234_v33 = vmul.f32 %v360_v31, %v233_v32 }
 0x1d5   :  { %v236_v34 = vadd.f32 2.0, %v234_v33  ;;  %v235_v35 = vmul.f32 %v234_v33, %v224_v25 }
 0x1d7   :  { %361 = vrcp.f32 %v236_v34 }
 0x1e1   :  { %v362_v36 = vpop.eup %361 }
 0x1e2   :  { %v238_v38 = vmul.f32 %v362_v36, %v235_v35 }
 0x1e4   :  { %v246_v39 = vmul.f32 %v296_v37, %v238_v38 }
 0x1e6   :  { %v248_v40 = vsel %vm247_vm2, %v246_v39, 0.0 }
 0x1e7   :  { %249 = vadd.xlane.f32.xlu0 %v248_v40 }
 0x1e8   :  { %374 = shalt.err (!%p371_p4)
}
 0x1e9   :  { %s375_s15 = scalar_lea.hbm %s509_s8, 128 }
 0x1ea   :  { %p376_p5 = scmp.ne.s32.totalorder %s509_s8, %s375_s15  ;;  %p379_p6 = scmp.lt.u32.totalorder %s375_s15, %s509_s8 }
 0x1ec   :  { %p381_p7 = pnand %p379_p6, %p376_p5 }
 0x1ee   :  { %384 = shalt.err (!%p381_p7)
}
 0x1ef   :  { %273 = dma.vmem_to_hbm [thread:$0]  %s271_s12, 128, %s509_s8, [#allocation4]   ;;  %v297_v41 = vld [vmem:[#allocation2] ss:$0 sm:$0xff]  ;;  %vm260_vm3 = vcmask 7168  }
 0x274   :  { %v250_v42 = vpop.xlane.xlu0 %249 }
 0x275   :  { %v258_v43 = vadd.f32 %v297_v41, %v250_v42 }
 0x277   :  { %261 = vst.msk [vmem:[%s508_s7] sm:$0xff] %vm260_vm3, %v258_v43 }
 0x278   :  { %385 = dma.done.wait [#allocation4], 128  }
 0x279   :  { %386 = vsyncadd [#allocation4], 4294967168 }
 0x27a   :  { %279 = vsyncpa [#allocation4], 1 }

</bundles_post_ra>
